<compile_context>
chip_gen: v6e
topology: v6e:2x2x1
jax: 0.10.0
libtpu: 0.0.40
codegen_flags: <defaults>
</compile_context>

<pallas_src>
import functools

import jax
import jax.numpy as jnp
from jax.experimental import pallas as pl
from jax.experimental.pallas import tpu as pltpu


def _contrastive_loss_kernel(t_ref, c_ref, n_ref, o_ref, *, C, Q, B, TB):
    """One batch tile: per-row loss for TB rows (rows >= B are masked to 0)."""
    i = pl.program_id(0)

    t = t_ref[...].astype(jnp.float32)                    # (TB, D)
    c = c_ref[...].astype(jnp.float32)                    # (TB, C, D)
    n = n_ref[...].astype(jnp.float32)                    # (TB, Q, D)

    # Dot products over D: VPU broadcast-multiply + lane reduction (f32).
    pos = jnp.sum(t[:, None, :] * c, axis=-1)             # (TB, C)
    neg = jnp.sum(t[:, None, :] * n, axis=-1)             # (TB, Q)

    # Stable log(sigmoid(x)) = min(x, 0) - log1p(exp(-|x|))  (== F.logsigmoid).
    def logsig(x):
        return jnp.minimum(x, 0.0) - jnp.log1p(jnp.exp(-jnp.abs(x)))

    pos_loss = -jnp.sum(logsig(pos), axis=1, keepdims=True)           # (TB, 1)
    neg_loss = -jnp.sum(logsig(-neg), axis=1, keepdims=True) * (1.0 / Q)

    per_row = pos_loss + neg_loss                                       # (TB, 1)

    # Zero the contribution of out-of-range rows in the (possibly partial)
    # last tile.  jnp.where is a select, so garbage/NaN in masked rows is safe.
    row = i * TB + jax.lax.broadcasted_iota(jnp.int32, (TB, 1), 0)
    o_ref[...] = jnp.where(row < B, per_row, 0.0)


def _choose_tile(B, row_bytes):
    if B <= 8:
        return B                                   # block dim == full array dim
    budget_rows = (8 * 1024 * 1024) // max(row_bytes, 1)
    tb = min(1024, budget_rows, B)
    return max(8, (tb // 8) * 8)


def contrastive_loss(target_embedding, context_embeddings, negative_embeddings,
                     num_negative_samples=6):
    B, D = target_embedding.shape
    _, C, _ = context_embeddings.shape
    _, Q, _ = negative_embeddings.shape
    assert Q == num_negative_samples
    K = C + Q
    itemsize = jnp.dtype(target_embedding.dtype).itemsize

    # VMEM per batch row: inputs (double buffered) + f32 working copies.
    row_bytes = (K + 1) * D * (2 * itemsize + 4)
    tb = _choose_tile(B, row_bytes)
    num_tiles = pl.cdiv(B, tb)

    kernel = functools.partial(_contrastive_loss_kernel, C=C, Q=Q, B=B, TB=tb)

    cost = pl.CostEstimate(
        flops=2 * B * K * D + 8 * B * K,
        transcendentals=2 * B * K,                  # exp + log1p per logit
        bytes_accessed=(target_embedding.size + context_embeddings.size
                        + negative_embeddings.size) * itemsize + B * 4,
    )

    per_row_loss = pl.pallas_call(
        kernel,
        out_shape=jax.ShapeDtypeStruct((B, 1), jnp.float32),
        grid=(num_tiles,),
        in_specs=[
            pl.BlockSpec((tb, D), lambda i: (i, 0)),
            pl.BlockSpec((tb, C, D), lambda i: (i, 0, 0)),
            pl.BlockSpec((tb, Q, D), lambda i: (i, 0, 0)),
        ],
        out_specs=pl.BlockSpec((tb, 1), lambda i: (i, 0)),
        compiler_params=pltpu.CompilerParams(
            dimension_semantics=("parallel",),
            vmem_limit_bytes=32 * 1024 * 1024,
        ),
        cost_estimate=cost,
    )(target_embedding, context_embeddings, negative_embeddings)

    # Final mean; masked rows contribute exactly 0.
    return jnp.sum(per_row_loss) / B


def _reference_loss(t, c, n, Q):
    # Pure-JAX reference mirroring the PyTorch module (same reduction order).
    pos = jnp.sum(t[:, None, :] * c, axis=-1)
    pos_loss = -jnp.sum(jax.nn.log_sigmoid(pos), axis=1)
    neg = jnp.sum(t[:, None, :] * n, axis=-1)
    neg_loss = -jnp.sum(jax.nn.log_sigmoid(-neg), axis=1) / Q
    return jnp.mean(pos_loss + neg_loss)


if __name__ == "__main__":
    B, C, Q, D = 2, 4, 6, 32  # batch, context size, negative samples, embed dim

    key = jax.random.PRNGKey(0)
    k1, k2, k3 = jax.random.split(key, 3)
    target_embedding = jax.random.normal(k1, (B, D), dtype=jnp.float32)
    context_embeddings = jax.random.normal(k2, (B, C, D), dtype=jnp.float32)
    negative_embeddings = jax.random.normal(k3, (B, Q, D), dtype=jnp.float32)

    loss = contrastive_loss(target_embedding, context_embeddings,
                            negative_embeddings, num_negative_samples=Q)
    loss = jax.block_until_ready(loss)

    ref = _reference_loss(target_embedding, context_embeddings,
                          negative_embeddings, Q)
    assert jnp.allclose(loss, ref, rtol=1e-5, atol=1e-5), (loss, ref)

    print("KERNEL_OK")
</pallas_src>

<mosaic_0001>
module attributes {stable_mosaic.version = 11 : i64} {
  func.func @_contrastive_loss_kernel(%arg0: i32, %arg1: memref<2x32xf32, #tpu.memory_space<vmem>>, %arg2: memref<2x4x32xf32, #tpu.memory_space<vmem>>, %arg3: memref<2x6x32xf32, #tpu.memory_space<vmem>>, %arg4: memref<2x1xf32, #tpu.memory_space<vmem>>) attributes {dimension_semantics = [#tpu.dimension_semantics<parallel>], iteration_bounds = array<i64: 1>, scalar_prefetch = 0 : i64, scratch_operands = 0 : i64, tpu.core_type = #tpu.core_type<tc>, window_params = [{transform_indices = @transform_0, window_bounds = array<i64: 2, 32>}, {transform_indices = @transform_1, window_bounds = array<i64: 2, 4, 32>}, {transform_indices = @transform_2, window_bounds = array<i64: 2, 6, 32>}, {transform_indices = @transform_3, window_bounds = array<i64: 2, 1>}]} {
    %c0 = arith.constant 0 : index
    %c0_0 = arith.constant 0 : index
    %0 = vector.load %arg1[%c0, %c0_0] : memref<2x32xf32, #tpu.memory_space<vmem>>, vector<2x32xf32>
    %c0_1 = arith.constant 0 : index
    %c0_2 = arith.constant 0 : index
    %c0_3 = arith.constant 0 : index
    %1 = vector.load %arg2[%c0_1, %c0_2, %c0_3] : memref<2x4x32xf32, #tpu.memory_space<vmem>>, vector<2x4x32xf32>
    %c0_4 = arith.constant 0 : index
    %c0_5 = arith.constant 0 : index
    %c0_6 = arith.constant 0 : index
    %2 = vector.load %arg3[%c0_4, %c0_5, %c0_6] : memref<2x6x32xf32, #tpu.memory_space<vmem>>, vector<2x6x32xf32>
    %3 = vector.shape_cast %0 : vector<2x32xf32> to vector<2x1x32xf32>
    %4 = vector.broadcast %3 : vector<2x1x32xf32> to vector<2x4x32xf32>
    %5 = arith.mulf %4, %1 : vector<2x4x32xf32>
    %cst = arith.constant dense<0.000000e+00> : vector<2x4xf32>
    %6 = vector.multi_reduction <add>, %5, %cst [2] : vector<2x4x32xf32> to vector<2x4xf32>
    %7 = vector.shape_cast %0 : vector<2x32xf32> to vector<2x1x32xf32>
    %8 = vector.broadcast %7 : vector<2x1x32xf32> to vector<2x6x32xf32>
    %9 = arith.mulf %8, %2 : vector<2x6x32xf32>
    %cst_7 = arith.constant dense<0.000000e+00> : vector<2x6xf32>
    %10 = vector.multi_reduction <add>, %9, %cst_7 [2] : vector<2x6x32xf32> to vector<2x6xf32>
    %cst_8 = arith.constant 0.000000e+00 : f32
    %11 = vector.broadcast %cst_8 : f32 to vector<2x4xf32>
    %12 = arith.minimumf %6, %11 : vector<2x4xf32>
    %13 = math.absf %6 : vector<2x4xf32>
    %cst_9 = arith.constant 0.000000e+00 : f32
    %14 = vector.broadcast %cst_9 : f32 to vector<2x4xf32>
    %15 = arith.subf %14, %13 : vector<2x4xf32>
    %16 = math.exp %15 : vector<2x4xf32>
    %17 = math.log1p %16 : vector<2x4xf32>
    %18 = arith.subf %12, %17 : vector<2x4xf32>
    %cst_10 = arith.constant dense<0.000000e+00> : vector<2xf32>
    %19 = vector.multi_reduction <add>, %18, %cst_10 [1] : vector<2x4xf32> to vector<2xf32>
    %20 = vector.shape_cast %19 : vector<2xf32> to vector<2x1xf32>
    %cst_11 = arith.constant 0.000000e+00 : f32
    %21 = vector.broadcast %cst_11 : f32 to vector<2x1xf32>
    %22 = arith.subf %21, %20 : vector<2x1xf32>
    %cst_12 = arith.constant 0.000000e+00 : f32
    %23 = vector.broadcast %cst_12 : f32 to vector<2x6xf32>
    %24 = arith.subf %23, %10 : vector<2x6xf32>
    %cst_13 = arith.constant 0.000000e+00 : f32
    %25 = vector.broadcast %cst_13 : f32 to vector<2x6xf32>
    %26 = arith.minimumf %24, %25 : vector<2x6xf32>
    %27 = math.absf %24 : vector<2x6xf32>
    %cst_14 = arith.constant 0.000000e+00 : f32
    %28 = vector.broadcast %cst_14 : f32 to vector<2x6xf32>
    %29 = arith.subf %28, %27 : vector<2x6xf32>
    %30 = math.exp %29 : vector<2x6xf32>
    %31 = math.log1p %30 : vector<2x6xf32>
    %32 = arith.subf %26, %31 : vector<2x6xf32>
    %cst_15 = arith.constant dense<0.000000e+00> : vector<2xf32>
    %33 = vector.multi_reduction <add>, %32, %cst_15 [1] : vector<2x6xf32> to vector<2xf32>
    %34 = vector.shape_cast %33 : vector<2xf32> to vector<2x1xf32>
    %cst_16 = arith.constant 0.000000e+00 : f32
    %35 = vector.broadcast %cst_16 : f32 to vector<2x1xf32>
    %36 = arith.subf %35, %34 : vector<2x1xf32>
    %cst_17 = arith.constant 0.166666672 : f32
    %37 = vector.broadcast %cst_17 : f32 to vector<2x1xf32>
    %38 = arith.mulf %36, %37 : vector<2x1xf32>
    %39 = arith.addf %22, %38 : vector<2x1xf32>
    %c2_i32 = arith.constant 2 : i32
    %40 = arith.muli %arg0, %c2_i32 : i32
    %41 = tpu.iota {dimensions = array<i32: 0>} : vector<2x1xi32>
    %42 = vector.broadcast %40 : i32 to vector<2x1xi32>
    %43 = arith.addi %42, %41 : vector<2x1xi32>
    %c2_i32_18 = arith.constant 2 : i32
    %44 = vector.broadcast %c2_i32_18 : i32 to vector<2x1xi32>
    %45 = arith.cmpi slt, %43, %44 : vector<2x1xi32>
    %cst_19 = arith.constant 0.000000e+00 : f32
    %46 = vector.broadcast %cst_19 : f32 to vector<2x1xf32>
    %47 = arith.select %45, %39, %46 : vector<2x1xi1>, vector<2x1xf32>
    %c0_20 = arith.constant 0 : index
    %c0_21 = arith.constant 0 : index
    %48 = vector.load %arg4[%c0_20, %c0_21] : memref<2x1xf32, #tpu.memory_space<vmem>>, vector<2x1xf32>
    tpu.vector_store %arg4[%c0_20, %c0_21], %47 {strides = array<i32>} : memref<2x1xf32, #tpu.memory_space<vmem>>, vector<2x1xf32>,
    return
  }
  func.func @transform_0(%arg0: i32) -> (i32, i32) {
    %c0_i32 = arith.constant 0 : i32
    %c0_i32_0 = arith.constant 0 : i32
    return %arg0, %c0_i32 : i32, i32
  }
  func.func @transform_1(%arg0: i32) -> (i32, i32, i32) {
    %c0_i32 = arith.constant 0 : i32
    %c0_i32_0 = arith.constant 0 : i32
    %c0_i32_1 = arith.constant 0 : i32
    return %arg0, %c0_i32, %c0_i32_0 : i32, i32, i32
  }
  func.func @transform_2(%arg0: i32) -> (i32, i32, i32) {
    %c0_i32 = arith.constant 0 : i32
    %c0_i32_0 = arith.constant 0 : i32
    %c0_i32_1 = arith.constant 0 : i32
    return %arg0, %c0_i32, %c0_i32_0 : i32, i32, i32
  }
  func.func @transform_3(%arg0: i32) -> (i32, i32) {
    %c0_i32 = arith.constant 0 : i32
    %c0_i32_0 = arith.constant 0 : i32
    return %arg0, %c0_i32 : i32, i32
  }
}

</mosaic_0001>

<bundles_post_ra>
// kernel: tpu_custom_call.1
= control target key start
LH: loop header
LB: loop body
LE: loop exit
PB: predicated region body
PF: predicated region fallthrough
CT: control target
= control target key end

     0   :  { %v31_v0 = vlaneseq  ;;  %v202_v1 = vmov 1966171168   ;;  %vm63_vm0 = vcmask 259072   ;;  %vm54_vm1 = vcmask 257024   ;;  %s272_s0 = inlined_call_operand.vmem [shape: f32[2,32], index: 0, kind: input, shape index: {}]   ;;  %s273_s2 = inlined_call_operand.vmem [shape: f32[2,6,32], index: 2, kind: input, shape index: {}]   ;;  %s274_s1 = inlined_call_operand.vmem [shape: f32[2,4,32], index: 1, kind: input, shape index: {}]   ;;  %s275_s3 = inlined_call_operand.vmem [shape: f32[2,1], index: 3, kind: output, shape index: {}]  }
   0x1   :  { %v29_v2 = vunpack.c.l.s4 %v202_v1  ;;  %v184_v3 = vld.sshfl [vmem:[%s272_s0] sm:$0x11 pattern:$0x75316420]  ;;  %v18_v13 = vld [vmem:[%s273_s2 + $0x8] sm:$0x3f] }
   0x2   :  { %v227_v4 = vshrl.u32 %v31_v0, 7  ;;  %v27_v6 = vcombine.high %v184_v3, %v184_v3  ;;  %v17_v9 = vld [vmem:[%s273_s2] sm:$0x3f]  ;;  %v103_v60 = vand.u32 127, %v31_v0  ;;  %vm112_vm6 = vcmask 1041409  }
   0x3   :  { %v30_v5 = vunpack.c.0.s8 %v29_v2  ;;  %v15_v12 = vld [vmem:[%s274_s1] sm:$0xf]  ;;  %v16_v14 = vld [vmem:[%s274_s1 + $0x4] sm:$0xf]  ;;  %vm115_vm7 = vcmask 25600   ;;  %vm164_vm8 = vcmask 41984  }
   0x4   :  { %v44_v8 = vsub.s32 0, %v227_v4  ;;  %vm176_vm9 = vcmp.lt.s32.totalorder %v227_v4, 2  ;;  %vm178_vm10 = vcmask 1024  }
   0x5   :  { %v33_v7 = vsub.s32 %v30_v5, %v227_v4 }
   0x7   :  { %v34_v10 = vrot.slane %v184_v3, %v33_v7  ;;  %v41_v11 = vrot.slane %v27_v6, %v33_v7 }
   0x9   :  { %v45_v15 = vrot.slane %v34_v10, %v44_v8  ;;  %v49_v16 = vrot.slane %v41_v11, %v44_v8 }
   0xb   :  { %v61_v17 = vmul.f32 %v45_v15, %v17_v9  ;;  %v52_v18 = vmul.f32 %v45_v15, %v15_v12  ;;  %v62_v19 = vmul.f32 %v49_v16, %v18_v13  ;;  %v53_v20 = vmul.f32 %v49_v16, %v16_v14 }
   0xc   :  { %v106_v12 = vsub.s32 %v103_v60, %v227_v4 }
   0xd   :  { %v64_v21 = vsel %vm63_vm0, %v61_v17, 0.0  ;;  %v55_v22 = vsel %vm54_vm1, %v52_v18, 0.0  ;;  %v67_v23 = vsel %vm63_vm0, %v62_v19, 0.0  ;;  %v58_v24 = vsel %vm54_vm1, %v53_v20, 0.0 }
   0xe   :  { %65 = vadd.xlane.f32.xlu0 %v64_v21  ;;  %56 = vadd.xlane.f32.xlu1 %v55_v22 }
  0x12   :  { %68 = vadd.xlane.f32.xlu0 %v67_v23  ;;  %59 = vadd.xlane.f32.xlu1 %v58_v24 }
  0x97   :  { %v66_v25 = vpop.xlane.xlu0 %65  ;;  %v243_v26 = vpop.xlane.xlu1 %56 }
  0x98   :  { %v120_v27 = vsub.f32 0.0, %v66_v25  ;;  %v72_v28 = vand.u32 2147483647, %v243_v26  ;;  %v70_v13 = vmin.f32 %v243_v26, 0.0 }
  0x9a   :  { %v124_v29 = vand.u32 2147483647, %v120_v27  ;;  %v74_v30 = vsub.f32 0.0, %v72_v28  ;;  %v122_v15 = vmin.f32 %v120_v27, 0.0 }
  0x9b   :  { %v246_v31 = vpop.xlane.xlu0 %68  ;;  %v248_v32 = vpop.xlane.xlu1 %59 }
  0x9c   :  { %v126_v33 = vsub.f32 0.0, %v124_v29  ;;  %v76_v34 = vmul.f32 1.442695, %v74_v30  ;;  %v121_v35 = vsub.f32 0.0, %v246_v31  ;;  %v73_v36 = vand.u32 2147483647, %v248_v32 }
  0x9d   :  { %v71_v16 = vmin.f32 %v248_v32, 0.0 }
  0x9e   :  { %v128_v37 = vmul.f32 1.442695, %v126_v33  ;;  %186 = vpow2.f32 %v76_v34  ;;  %v125_v38 = vand.u32 2147483647, %v121_v35  ;;  %v75_v39 = vsub.f32 0.0, %v73_v36 }
  0x9f   :  { %v123_v23 = vmin.f32 %v121_v35, 0.0 }
  0xa0   :  { %188 = vpow2.f32 %v128_v37  ;;  %v127_v40 = vsub.f32 0.0, %v125_v38  ;;  %v78_v41 = vmul.f32 1.442695, %v75_v39 }
  0xa2   :  { %v130_v42 = vmul.f32 1.442695, %v127_v40  ;;  %190 = vpow2.f32 %v78_v41 }
  0xa4   :  { %192 = vpow2.f32 %v130_v42 }
  0xab   :  { %v187_v43 = vpop.eup %186 }
  0xac   :  { %v80_v44 = vadd.f32 1.0, %v187_v43  ;;  %v83_v51 = vmul.f32 -0.5, %v187_v43  ;;  %v86_v54 = vand.u32 2147483647, %v187_v43 }
  0xad   :  { %v189_v45 = vpop.eup %188 }
  0xae   :  { %v132_v46 = vadd.f32 1.0, %v189_v45  ;;  %194 = vlog2.f32 %v80_v44  ;;  %v135_v52 = vmul.f32 -0.5, %v189_v45  ;;  %v84_v53 = vadd.f32 1.0, %v83_v51 }
  0xaf   :  { %v191_v47 = vpop.eup %190  ;;  %v138_v59 = vand.u32 2147483647, %v189_v45  ;;  %vm253_vm2 = vcmp.lt.f32.partialorder %v86_v54, 0.0004427343 }
  0xb0   :  { %196 = vlog2.f32 %v132_v46  ;;  %v89_v49 = vadd.f32 1.0, %v191_v47  ;;  %v92_v55 = vmul.f32 -0.5, %v191_v47  ;;  %v136_v56 = vadd.f32 1.0, %v135_v52 }
  0xb1   :  { %v193_v48 = vpop.eup %192  ;;  %v85_v63 = vmul.f32 %v187_v43, %v84_v53  ;;  %v95_v7 = vand.u32 2147483647, %v191_v47  ;;  %vm257_vm3 = vcmp.lt.f32.partialorder %v138_v59, 0.0004427343 }
  0xb2   :  { %v141_v50 = vadd.f32 1.0, %v193_v48  ;;  %198 = vlog2.f32 %v89_v49  ;;  %v144_v57 = vmul.f32 -0.5, %v193_v48  ;;  %v93_v2 = vadd.f32 1.0, %v92_v55 }
  0xb3   :  { %v137_v5 = vmul.f32 %v189_v45, %v136_v56  ;;  %v147_v0 = vand.u32 2147483647, %v193_v48  ;;  %vm96_vm4 = vcmp.lt.f32.partialorder %v95_v7, 0.0004427343 }
  0xb4   :  { %200 = vlog2.f32 %v141_v50  ;;  %v145_v6 = vadd.f32 1.0, %v144_v57  ;;  %v94_v18 = vmul.f32 %v191_v47, %v93_v2 }
  0xb5   :  { %vm148_vm5 = vcmp.lt.f32.partialorder %v147_v0, 0.0004427343 }
  0xb6   :  { %v146_v21 = vmul.f32 %v193_v48, %v145_v6 }
  0xbb   :  { %v195_v58 = vpop.eup %194 }
  0xbc   :  { %v82_v61 = vmul.f32 0.6931472, %v195_v58 }
  0xbd   :  { %v197_v62 = vpop.eup %196 }
  0xbe   :  { %v134_v3 = vmul.f32 0.6931472, %v197_v62  ;;  %v88_v9 = vsel %vm253_vm2, %v85_v63, %v82_v61 }
  0xbf   :  { %v199_v10 = vpop.eup %198  ;;  %v98_v19 = vsub.f32 %v70_v13, %v88_v9 }
  0xc0   :  { %v140_v11 = vsel %vm257_vm3, %v137_v5, %v134_v3  ;;  %v91_v17 = vmul.f32 0.6931472, %v199_v10 }
  0xc1   :  { %v201_v14 = vpop.eup %200  ;;  %v150_v22 = vsub.f32 %v122_v15, %v140_v11  ;;  %v107_v30 = vrot.slane %v98_v19, %v106_v12 }
  0xc2   :  { %v143_v20 = vmul.f32 0.6931472, %v201_v14  ;;  %v97_v24 = vsel %vm96_vm4, %v94_v18, %v91_v17 }
  0xc3   :  { %v99_v28 = vsub.f32 %v71_v16, %v97_v24  ;;  %v157_v27 = vrot.slane %v150_v22, %v106_v12 }
  0xc4   :  { %v149_v25 = vsel %vm148_vm5, %v146_v21, %v143_v20 }
  0xc5   :  { %v151_v29 = vsub.f32 %v123_v23, %v149_v25  ;;  %v111_v26 = vrot.slane %v99_v28, %v106_v12 }
  0xc7   :  { %v161_v31 = vrot.slane %v151_v29, %v106_v12  ;;  %v113_v32 = vsel %vm112_vm6, %v111_v26, %v107_v30 }
  0xc8   :  { %v116_v33 = vsel %vm115_vm7, %v113_v32, 0.0 }
  0xc9   :  { %v162_v34 = vsel %vm112_vm6, %v161_v31, %v157_v27  ;;  %117 = vadd.xlane.f32.xlu1 %v116_v33 }
  0xca   :  { %v165_v36 = vsel %vm164_vm8, %v162_v34, 0.0 }
  0xcb   :  { %166 = vadd.xlane.f32.xlu0 %v165_v36 }
 0x152   :  { %v118_v37 = vpop.xlane.xlu1 %117 }
 0x153   :  { %v119_v39 = vsub.f32 0.0, %v118_v37 }
 0x154   :  { %v167_v35 = vpop.xlane.xlu0 %166 }
 0x155   :  { %v168_v38 = vsub.f32 0.0, %v167_v35 }
 0x157   :  { %v169_v40 = vmul.f32 0.16666667, %v168_v38 }
 0x159   :  { %v170_v41 = vadd.f32 %v169_v40, %v119_v39 }
 0x15b   :  { %v177_v42 = vsel %vm176_vm9, %v170_v41, 0.0 }
 0x15c   :  { %179 = vst.msk [vmem:[%s275_s3] sm:$0x3] %vm178_vm10, %v177_v42 }

</bundles_post_ra>
